<compile_context>
chip_gen: v7x
topology: tpu7x:2x2x1
jax: 0.10.0
libtpu: 0.0.40
codegen_flags: <defaults>
</compile_context>

<pallas_src>
import math

import jax
import jax.numpy as jnp
from jax.experimental import pallas as pl
from jax.experimental.pallas import tpu as pltpu

# Version-robust aliases (newer jax: MemorySpace / CompilerParams; older
# releases used TPUMemorySpace / TPUCompilerParams).
_MemorySpace = getattr(pltpu, "MemorySpace", None) or getattr(pltpu, "TPUMemorySpace")
_CompilerParams = getattr(pltpu, "CompilerParams", None) or getattr(pltpu, "TPUCompilerParams")


def _round_up(x, m):
    return (x + m - 1) // m * m


def _vmem_capacity_bytes():
    try:
        return int(pltpu.get_tpu_info().vmem_capacity_bytes)
    except Exception:
        return 64 * 1024 * 1024  # conservative (v7x-sized) fallback


def _make_kernel(has_base):
    def _body(alpha_ref, x_ref, a_ref, b_ref, o_ref, base_ref=None):
        alpha = alpha_ref[0]                                   # f32 scalar from SMEM
        # [TM, in_dim] @ [in_dim, rank] -> f32 [TM, rank] on the MXU.
        xa = jnp.dot(x_ref[...], a_ref[...], preferred_element_type=jnp.float32)
        # [TM, rank] @ [rank, out_dim] -> f32; alpha applied to the f32 result
        # (no extra bf16 rounding of the scaled intermediate).
        out = alpha * jnp.dot(xa.astype(b_ref.dtype), b_ref[...],
                              preferred_element_type=jnp.float32)
        if base_ref is not None:                               # fused residual add
            out = out + base_ref[...].astype(jnp.float32)
        o_ref[...] = out.astype(o_ref.dtype)

    if has_base:
        def kernel(alpha_ref, x_ref, a_ref, b_ref, base_ref, o_ref):
            _body(alpha_ref, x_ref, a_ref, b_ref, o_ref, base_ref)
    else:
        def kernel(alpha_ref, x_ref, a_ref, b_ref, o_ref):
            _body(alpha_ref, x_ref, a_ref, b_ref, o_ref)
    return kernel


def lora_forward(x, A, B, alpha, *, base=None, tile_m=None, compute_dtype=None,
                 out_dtype=None, dimension_semantics=None):
    """out = alpha * (x @ A @ B) [+ base], as one Pallas TPU kernel."""
    batch, in_dim = x.shape
    in_dim_a, rank = A.shape
    rank_b, out_dim = B.shape
    assert in_dim == in_dim_a and rank == rank_b
    if base is not None:
        assert base.shape == (batch, out_dim)
    out_dtype = out_dtype if out_dtype is not None else x.dtype

    # Casts happen ONCE in the wrapper. A/B are tiny; ideally x already arrives
    # in compute_dtype so its HBM read traffic is halved upstream of this call.
    if compute_dtype is not None:
        A = A.astype(compute_dtype)
        B = B.astype(compute_dtype)
        if x.dtype != compute_dtype:
            x = x.astype(compute_dtype)

    x_b = x.dtype.itemsize
    o_b = jnp.dtype(out_dtype).itemsize
    base_b = base.dtype.itemsize if base is not None else 0

    vmem_cap = _vmem_capacity_bytes()
    # Generation-aware streamed working-set budget: ~64 MiB on 128 MiB parts
    # (v5e / v6e), ~28 MiB on 64 MiB parts (v7x).
    budget = 64 * 1024 * 1024 if vmem_cap >= 96 * 1024 * 1024 else 28 * 1024 * 1024

    if tile_m is None:
        per_row = (2 * in_dim * x_b                 # double-buffered x tile
                   + 2 * out_dim * o_b              # double-buffered out tile
                   + 2 * out_dim * base_b           # double-buffered base tile
                   + 6 * rank                       # f32 xa + its narrow recast
                   + 4 * out_dim)                   # f32 matmul result pre-store
        tile_m = max(8, min(budget // per_row, 4096))
        tile_m = tile_m // 128 * 128 if tile_m >= 128 else tile_m // 8 * 8
    tile_m = int(min(tile_m, _round_up(batch, 8)))

    # No wrapper-side pad of x: the partial tail tile is masked by Pallas.
    grid = (pl.cdiv(batch, tile_m),)

    # VMEM estimate including in-kernel intermediates; capped below physical
    # VMEM (<= ~56 MiB on v7x, where physical is 64 MiB).
    est = (2 * tile_m * in_dim * x_b
           + 2 * tile_m * out_dim * o_b
           + 2 * tile_m * out_dim * base_b
           + 2 * (in_dim * rank * A.dtype.itemsize + rank * out_dim * B.dtype.itemsize)
           + tile_m * (6 * rank + 4 * out_dim)
           + 2 * 1024 * 1024)
    vmem_limit = int(min(max(est * 1.25, 32 * 1024 * 1024),
                         vmem_cap - 8 * 1024 * 1024))

    alpha_arr = jnp.asarray([alpha], dtype=jnp.float32)

    in_specs = [
        # alpha: whole (1,) array in SMEM -> one compiled kernel for all alphas.
        pl.BlockSpec(memory_space=_MemorySpace.SMEM),
        # x: streamed per-M-tile, double-buffered by the pipeline.
        pl.BlockSpec((tile_m, in_dim), lambda i: (i, 0)),
        # A, B: constant index_map -> fetched once, resident in VMEM.
        pl.BlockSpec((in_dim, rank), lambda i: (0, 0)),
        pl.BlockSpec((rank, out_dim), lambda i: (0, 0)),
    ]
    args = [alpha_arr, x, A, B]
    if base is not None:
        in_specs.append(pl.BlockSpec((tile_m, out_dim), lambda i: (i, 0)))
        args.append(base)

    if dimension_semantics is None:
        # Safe, portable default; on v7x pass (pltpu.CORE_PARALLEL,) to shard
        # the bandwidth-bound M loop across both TensorCores.
        dimension_semantics = ("parallel",)

    return pl.pallas_call(
        _make_kernel(base is not None),
        out_shape=jax.ShapeDtypeStruct((batch, out_dim), out_dtype),
        grid=grid,
        in_specs=in_specs,
        out_specs=pl.BlockSpec((tile_m, out_dim), lambda i: (i, 0)),
        compiler_params=_CompilerParams(
            dimension_semantics=dimension_semantics,
            vmem_limit_bytes=vmem_limit,
        ),
    )(*args)


if __name__ == "__main__":
    # Small shapes consistent with LoRALayer(in_dim, out_dim, rank, alpha).
    batch, in_dim, out_dim, rank = 8, 32, 32, 4
    alpha = 8.0

    key = jax.random.PRNGKey(0)
    kx, ka, kb, kbase = jax.random.split(key, 4)

    # A ~ kaiming_uniform_(a=sqrt(5)) over (in_dim, rank); PyTorch fan_in =
    # A.size(1) = rank, gain = sqrt(2/(1+a^2)), bound = gain*sqrt(3/fan_in).
    a_neg_slope = math.sqrt(5.0)
    gain = math.sqrt(2.0 / (1.0 + a_neg_slope ** 2))
    bound = gain * math.sqrt(3.0 / rank)
    A = jax.random.uniform(ka, (in_dim, rank), jnp.float32, -bound, bound)
    B0 = jnp.zeros((rank, out_dim), jnp.float32)        # module init: B = 0
    x = jax.random.normal(kx, (batch, in_dim), jnp.float32)

    # 1) Module-init semantics (B == 0), f32 path.
    out = jax.block_until_ready(lora_forward(x, A, B0, alpha))
    ref = alpha * (x @ A @ B0)
    assert out.shape == (batch, out_dim)
    assert jnp.allclose(out, ref, atol=1e-5, rtol=1e-5)

    # 2) Nonzero B so both matmuls are exercised.
    B2 = jax.random.normal(kb, (rank, out_dim), jnp.float32) * 0.02
    out2 = jax.block_until_ready(lora_forward(x, A, B2, alpha))
    ref2 = alpha * (x @ A @ B2)
    assert jnp.allclose(out2, ref2, atol=1e-4, rtol=1e-4)

    # 3) Ragged batch: tail tile masked in-kernel, no wrapper pad / slice.
    x3 = jax.random.normal(kx, (10, in_dim), jnp.float32)
    out3 = jax.block_until_ready(lora_forward(x3, A, B2, alpha))
    ref3 = alpha * (x3 @ A @ B2)
    assert out3.shape == (10, out_dim)
    assert jnp.allclose(out3, ref3, atol=1e-4, rtol=1e-4)

    # 4) Fused residual add + bf16 MXU operands + bf16 output (v6e/v7x path).
    base = jax.random.normal(kbase, (batch, out_dim), jnp.float32)
    xb = x.astype(jnp.bfloat16)                          # activations already bf16
    out4 = jax.block_until_ready(
        lora_forward(xb, A, B2, alpha, base=base,
                     compute_dtype=jnp.bfloat16, out_dtype=jnp.bfloat16))
    xw = xb.astype(jnp.float32)
    Aw = A.astype(jnp.bfloat16).astype(jnp.float32)
    Bw = B2.astype(jnp.bfloat16).astype(jnp.float32)
    ref4 = base + alpha * (xw @ Aw @ Bw)
    assert out4.dtype == jnp.bfloat16
    assert jnp.allclose(out4.astype(jnp.float32), ref4, atol=5e-2, rtol=5e-2)

    print("KERNEL_OK")
</pallas_src>

<mosaic_0001>
module attributes {stable_mosaic.version = 11 : i64} {
  func.func @kernel(%arg0: i32, %arg1: memref<1xf32, #tpu.memory_space<smem>>, %arg2: memref<8x32xf32, #tpu.memory_space<vmem>>, %arg3: memref<32x4xf32, #tpu.memory_space<vmem>>, %arg4: memref<4x32xf32, #tpu.memory_space<vmem>>, %arg5: memref<8x32xf32, #tpu.memory_space<vmem>>) attributes {dimension_semantics = [#tpu.dimension_semantics<parallel>], iteration_bounds = array<i64: 1>, scalar_prefetch = 0 : i64, scratch_operands = 0 : i64, tpu.core_type = #tpu.core_type<tc>, window_params = [{transform_indices = @transform_0, window_bounds = array<i64: 1>}, {transform_indices = @transform_1, window_bounds = array<i64: 8, 32>}, {pipeline_mode = #tpu.pipeline_mode<synchronous>, transform_indices = @transform_2, window_bounds = array<i64: 32, 4>}, {pipeline_mode = #tpu.pipeline_mode<synchronous>, transform_indices = @transform_3, window_bounds = array<i64: 4, 32>}, {transform_indices = @transform_4, window_bounds = array<i64: 8, 32>}]} {
    %c0 = arith.constant 0 : index
    %0 = memref.load %arg1[%c0] : memref<1xf32, #tpu.memory_space<smem>>
    %c0_0 = arith.constant 0 : index
    %c0_1 = arith.constant 0 : index
    %1 = vector.load %arg2[%c0_0, %c0_1] : memref<8x32xf32, #tpu.memory_space<vmem>>, vector<8x32xf32>
    %c0_2 = arith.constant 0 : index
    %c0_3 = arith.constant 0 : index
    %2 = vector.load %arg3[%c0_2, %c0_3] : memref<32x4xf32, #tpu.memory_space<vmem>>, vector<32x4xf32>
    %cst = arith.constant dense<0.000000e+00> : vector<8x4xf32>
    %3 = tpu.matmul %1, %2, %cst {dimension_numbers = #tpu.dot_dimension_numbers<[1], [0], [0], [1], [0, 0, 1, 1], [], []>} : vector<8x32xf32>, vector<32x4xf32>, vector<8x4xf32> -> vector<8x4xf32>
    %c0_4 = arith.constant 0 : index
    %c0_5 = arith.constant 0 : index
    %4 = vector.load %arg4[%c0_4, %c0_5] : memref<4x32xf32, #tpu.memory_space<vmem>>, vector<4x32xf32>
    %cst_6 = arith.constant dense<0.000000e+00> : vector<8x32xf32>
    %5 = tpu.matmul %3, %4, %cst_6 {dimension_numbers = #tpu.dot_dimension_numbers<[1], [0], [0], [1], [0, 0, 1, 1], [], []>} : vector<8x4xf32>, vector<4x32xf32>, vector<8x32xf32> -> vector<8x32xf32>
    %6 = vector.broadcast %0 : f32 to vector<8x32xf32>
    %7 = arith.mulf %6, %5 : vector<8x32xf32>
    %c0_7 = arith.constant 0 : index
    %c0_8 = arith.constant 0 : index
    %8 = vector.load %arg5[%c0_7, %c0_8] : memref<8x32xf32, #tpu.memory_space<vmem>>, vector<8x32xf32>
    tpu.vector_store %arg5[%c0_7, %c0_8], %7 {strides = array<i32>} : memref<8x32xf32, #tpu.memory_space<vmem>>, vector<8x32xf32>,
    return
  }
  func.func @transform_0(%arg0: i32) -> i32 {
    %c0_i32 = arith.constant 0 : i32
    %c0_i32_0 = arith.constant 0 : i32
    return %c0_i32 : i32
  }
  func.func @transform_1(%arg0: i32) -> (i32, i32) {
    %c0_i32 = arith.constant 0 : i32
    %c0_i32_0 = arith.constant 0 : i32
    return %arg0, %c0_i32 : i32, i32
  }
  func.func @transform_2(%arg0: i32) -> (i32, i32) {
    %c0_i32 = arith.constant 0 : i32
    %c0_i32_0 = arith.constant 0 : i32
    %c0_i32_1 = arith.constant 0 : i32
    return %c0_i32, %c0_i32_0 : i32, i32
  }
  func.func @transform_3(%arg0: i32) -> (i32, i32) {
    %c0_i32 = arith.constant 0 : i32
    %c0_i32_0 = arith.constant 0 : i32
    %c0_i32_1 = arith.constant 0 : i32
    return %c0_i32, %c0_i32_0 : i32, i32
  }
  func.func @transform_4(%arg0: i32) -> (i32, i32) {
    %c0_i32 = arith.constant 0 : i32
    %c0_i32_0 = arith.constant 0 : i32
    return %arg0, %c0_i32 : i32, i32
  }
}

</mosaic_0001>

<bundles_post_ra>
// kernel: tpu_custom_call.1
= control target key start
LH: loop header
LB: loop body
LE: loop exit
PB: predicated region body
PF: predicated region fallthrough
CT: control target
= control target key end

     0   :  { %v255_v3 = vmov 0.0|0.0   ;;  %vm256_vm0 = vmmov 0   ;;  %v257_v6 = vmov 0.0   ;;  %s319_s0 = inlined_call_operand.<no memory space> [shape: f32[1], index: 0, kind: input, shape index: {}]   ;;  %s320_s1 = inlined_call_operand.vmem [shape: f32[8,32], index: 1, kind: input, shape index: {}]   ;;  %s321_s2 = inlined_call_operand.vmem [shape: f32[32,4], index: 2, kind: input, shape index: {}]   ;;  %s322_s3 = inlined_call_operand.vmem [shape: f32[4,32], index: 3, kind: input, shape index: {}]   ;;  %s323_s4 = inlined_call_operand.hbm [shape: f32[8,32], index: 4, kind: output, shape index: {}]  }
   0x1   :  { %v21_v0 = vld [vmem:[%s321_s2] sm:$0xff]  ;;  %v22_v1 = vld [vmem:[%s321_s2 + $0x8] sm:$0xff]  ;;  %v23_v2 = vld [vmem:[%s321_s2 + $0x10] sm:$0xff]  ;;  %221 = vmatprep.subr.bf16.mxu0 %v255_v3  ;;  %213 = vmatprep.mubr.msk.f32.mxu0 %vm256_vm0, %v257_v6 }
   0x2   :  { %v222_v4 = vpack.c.bf16 %v22_v1, %v21_v0  ;;  %v24_v5 = vld [vmem:[%s321_s2 + $0x18] sm:$0xff] }
   0x3   :  { %10 = vsyncpa [#allocation4], 0  ;;  %216 = vmatprep.subr.mxu1 %v257_v6  ;;  %218 = vmatprep.mubr.msk.f32.mxu1 %vm256_vm0, %v257_v6  ;;  %v225_v7 = vpack.c.bf16 %v24_v5, %v23_v2  ;;  %v20_v8 = vld [vmem:[%s320_s1] sm:$0xff]  ;;  %vm25_vm1 = vcmask 261120   ;;  %vm104_vm2 = vcmask 1043456   ;;  %vm100_vm3 = vcmask 31744  }
   0x4   :  { %223 = vmatpush3.bf16.msra.mxu0 %v222_v4  ;;  %v99_v9 = vld [vmem:[%s322_s3] sm:$0xf]  ;;  %v178_v12 = vstv %s319_s0  ;;  %s258_s28 = smov [#allocation3]  }
   0x5   :  { %224 = vmatprep.subr.bf16.mxu0 %v255_v3  ;;  %217 = vmatpush3.msk.msra.mxu1 %vm104_vm2, %v99_v9  ;;  %s187_s29 = sshll.u32 %s258_s28, 4  ;;  %s188_s29 = int_to_ptr.vmem [resolvable:$true] %s187_s29 }
   0x6   :  { %s231_s1 = scalar_lea.vmem %s188_s29, 128  ;;  %p236_p1 = scmp.lt.s32.totalorder %s188_s29, %s188_s29 }
   0x7   :  { %p232_p0 = scmp.ne.s32.totalorder %s188_s29, %s231_s1  ;;  %p237_p2 = scmp.lt.s32.totalorder %s231_s1, %s231_s1 }
   0x8   :  { %226 = vmatpush3.bf16.msra.mxu0 %v225_v7 }
   0x9   :  { %p238_p3 = por %p237_p2, %p236_p1 }
   0xb   :  { %214 = vmatmul.mubr.msk.f32.vlgmr.msra.gmra.mrb[0].mxu0 %vm25_vm1, %v20_v8  ;;  %p239_p4 = pnand %p238_p3, %p232_p0 }
  0xde   :  { %v95_v10 = vpop.f32.mrb[0].mxu0 }
  0xdf   :  { %v215_v11 = vpop.f32.mrb[1].mxu0  ;;  %219 = vmatmul.mubr.msk.f32.vlgmr.msra.gmra.mrb[0].mxu1 %vm100_vm3, %v95_v10 }
 0x1b2   :  { %v174_v13 = vpop.f32.mrb[0].mxu1 }
 0x1b3   :  { %v179_v14 = vmul.f32 %v178_v12, %v174_v13  ;;  %v220_v15 = vpop.f32.mrb[1].mxu1 }
 0x1b5   :  { %180 = vst.msk [vmem:[#allocation3] sm:$0xff] %vm25_vm1, %v179_v14 }
 0x1b6   :  { %242 = shalt.err (!%p239_p4)
}
 0x1b7   :  { %s243_s5 = scalar_lea.hbm %s323_s4, 128 }
 0x1b8   :  { %p244_p5 = scmp.ne.s32.totalorder %s323_s4, %s243_s5  ;;  %p247_p6 = scmp.lt.u32.totalorder %s243_s5, %s323_s4 }
 0x1ba   :  { %p249_p7 = pnand %p247_p6, %p244_p5 }
 0x1bc   :  { %252 = shalt.err (!%p249_p7)
}
 0x1bd   :  { %190 = dma.vmem_to_hbm [thread:$0]  %s188_s29, 128, %s323_s4, [#allocation4]  }
 0x1be   :  { %253 = dma.done.wait [#allocation4], 128  }
 0x1bf   :  { %254 = vsyncadd [#allocation4], 4294967168 }
 0x1c0   :  { %194 = vsyncpa [#allocation4], 1 }

</bundles_post_ra>
